<compile_context>
chip_gen: v6e
topology: v6e:2x2x1
jax: 0.10.0
libtpu: 0.0.40
codegen_flags: <defaults>
</compile_context>

<pallas_src>
import functools

import jax
import jax.numpy as jnp
from jax.experimental import pallas as pl
from jax.experimental.pallas import tpu as pltpu

HALF = 0.5
HIDDEN_SIZE = 32
ITERATIONS = 3
B_TILE = 128          # demo tile; raise (multiple of 128) for production batches


def _round_up(x, m):
    return (x + m - 1) // m * m


def _deepsic_fused_kernel(rxT_ref, w1_ref, b1_ref, w2_ref, b2_ref,
                          det_ref, probs_ref, act_ref,
                          *, iterations, n_users, n_ant, matmul_dtype):
    """All users + all iterations for one batch tile, feature-major layout."""
    uh = w1_ref.shape[0]          # U * H
    bt = rxT_ref.shape[1]         # B_TILE (lanes)

    # Persistent activation buffer [n_ant + U, B_TILE]:
    #   rx rows written once per tile, prob rows overwritten every iteration.
    act_ref[:n_ant, :] = rxT_ref[...]
    act_ref[n_ant:, :] = jnp.full((n_users, bt), HALF, jnp.float32)

    w1 = w1_ref[...]                                           # [U*H, n_ant+U] bf16
    w2 = w2_ref[...]                                           # [U, U*H]       bf16
    # Hoist bias broadcasts out of the unrolled loop (JAX does not CSE them).
    b1 = jnp.broadcast_to(b1_ref[...], (uh, bt))               # [U*H, B_TILE]  f32
    b2 = jnp.broadcast_to(b2_ref[...], (n_users, bt))          # [U, B_TILE]    f32

    logit = jnp.zeros((n_users, bt), jnp.float32)
    probs = jnp.full((n_users, bt), HALF, jnp.float32)
    for it in range(iterations):                 # static trip count -> unrolled
        x = act_ref[...].astype(matmul_dtype)                  # [n_ant+U, B_TILE]
        pre = jnp.dot(w1, x, preferred_element_type=jnp.float32) + b1
        h = jnp.maximum(pre, 0.0)                              # [U*H, B_TILE] f32
        logit = jnp.dot(w2, h.astype(matmul_dtype),
                        preferred_element_type=jnp.float32) + b2   # [U, B_TILE]
        # sigmoid(l1 - l0) == softmax([l0, l1])[:, 1]; f32, overflow-safe.
        probs = 1.0 / (1.0 + jnp.exp(-logit))
        if it + 1 < iterations:
            act_ref[n_ant:, :] = probs                         # feed next iteration

    probs_ref[...] = probs
    # Hard decision from the logit sign (== sign(probs - 0.5) up to rounding),
    # torch.sign semantics (0 at exactly 0), then BPSK demodulate.
    symbols = jnp.where(logit > 0.0, 1.0, jnp.where(logit < 0.0, -1.0, 0.0))
    det_ref[...] = HALF * (1.0 - symbols)


def _pack_params(params, n_ant, n_users, matmul_dtype):
    """Pack per-user MLPs into two lane-dense, feature-major matmuls (trace time)."""
    w1, b1, w2, b2 = params          # [U,in_dim,H], [U,1,H], [U,H,2], [U,1,2]
    hidden = w1.shape[-1]
    k_dim = n_ant + n_users

    w1_blocks = []
    for k in range(n_users):
        blk = jnp.zeros((hidden, k_dim), jnp.float32)
        blk = blk.at[:, :n_ant].set(w1[k, :n_ant, :].T)        # rx-facing columns
        for j in range(n_users):
            if j == k:
                continue                                        # own prob -> zero col
            src = n_ant + (j if j < k else j - 1)               # probs[:, idx] order
            blk = blk.at[:, n_ant + j].set(w1[k, src, :])
        w1_blocks.append(blk)
    w1_packed = jnp.concatenate(w1_blocks, axis=0).astype(matmul_dtype)   # [U*H, n_ant+U]

    b1_packed = jnp.reshape(b1[:, 0, :], (n_users * hidden, 1))           # [U*H, 1] f32

    w2_bd = jnp.zeros((n_users, n_users * hidden), jnp.float32)           # [U, U*H]
    for k in range(n_users):
        w2_bd = w2_bd.at[k, k * hidden:(k + 1) * hidden].set(w2[k, :, 1] - w2[k, :, 0])
    w2_bd = w2_bd.astype(matmul_dtype)

    b2_diff = (b2[:, 0, 1] - b2[:, 0, 0]).reshape(n_users, 1)             # [U, 1] f32
    return w1_packed, b1_packed, w2_bd, b2_diff


def trainer_forward(rx, params, n_users, iterations=ITERATIONS,
                    b_tile=B_TILE, matmul_dtype=jnp.bfloat16):
    """Mirrors Trainer.forward. Returns (detected_words, final_probs), each [B, U]."""
    batch, n_ant = rx.shape
    hidden = params[0].shape[-1]
    uh = n_users * hidden
    k_dim = n_ant + n_users

    b_tile = max(128, min(b_tile, _round_up(batch, 128)))
    padded = _round_up(batch, b_tile)
    rx_t = rx.T                                                # [n_ant, B] feature-major
    if padded != batch:
        rx_t = jnp.pad(rx_t, ((0, 0), (0, padded - batch)))

    w1p, b1p, w2bd, b2d = _pack_params(params, n_ant, n_users, matmul_dtype)

    kernel = functools.partial(_deepsic_fused_kernel, iterations=iterations,
                               n_users=n_users, n_ant=n_ant, matmul_dtype=matmul_dtype)

    det_t, probs_t = pl.pallas_call(
        kernel,
        out_shape=(
            jax.ShapeDtypeStruct((n_users, padded), jnp.float32),
            jax.ShapeDtypeStruct((n_users, padded), jnp.float32),
        ),
        grid=(padded // b_tile,),
        in_specs=[
            pl.BlockSpec((n_ant, b_tile), lambda i: (0, i)),       # rx tile (pipelined)
            pl.BlockSpec((uh, k_dim), lambda i: (0, 0)),           # W1 (VMEM-resident)
            pl.BlockSpec((uh, 1), lambda i: (0, 0)),               # b1
            pl.BlockSpec((n_users, uh), lambda i: (0, 0)),         # W2 block-diag diff
            pl.BlockSpec((n_users, 1), lambda i: (0, 0)),          # b2 diff
        ],
        out_specs=(
            pl.BlockSpec((n_users, b_tile), lambda i: (0, i)),
            pl.BlockSpec((n_users, b_tile), lambda i: (0, i)),
        ),
        scratch_shapes=[pltpu.VMEM((k_dim, b_tile), jnp.float32)],  # activation buffer
        compiler_params=pltpu.CompilerParams(
            dimension_semantics=("parallel",)),                     # 2-TC sharding on v7x
    )(rx_t, w1p, b1p, w2bd, b2d)

    detected = det_t[:, :batch].T
    probs = probs_t[:, :batch].T
    return detected, probs


def init_params(key, n_users, in_dim, hidden):
    k1, k2, k3, k4 = jax.random.split(key, 4)
    w1 = 0.1 * jax.random.normal(k1, (n_users, in_dim, hidden), jnp.float32)
    b1 = 0.1 * jax.random.normal(k2, (n_users, 1, hidden), jnp.float32)
    w2 = 0.1 * jax.random.normal(k3, (n_users, hidden, 2), jnp.float32)
    b2 = 0.1 * jax.random.normal(k4, (n_users, 1, 2), jnp.float32)
    return w1, b1, w2, b2


def _reference_forward_f32(rx, params, n_users, iterations=ITERATIONS):
    """Pure-JAX f32 mirror of the original per-user PyTorch formulation."""
    w1, b1, w2, b2 = params
    batch = rx.shape[0]
    probs = HALF * jnp.ones((batch, n_users), jnp.float32)
    for _ in range(iterations):
        cols = []
        for k in range(n_users):
            idx = jnp.array([j for j in range(n_users) if j != k], jnp.int32)
            x = jnp.concatenate([rx, probs[:, idx]], axis=1)
            h = jnp.maximum(x @ w1[k] + b1[k], 0.0)
            logits = h @ w2[k] + b2[k]
            cols.append(jax.nn.softmax(logits, axis=1)[:, 1])
        probs = jnp.stack(cols, axis=1)
    symbols = jnp.sign(probs - HALF)
    return HALF * (1.0 - symbols), probs


def _reference_forward_matched(rx, params, n_users, iterations=ITERATIONS,
                               matmul_dtype=jnp.bfloat16):
    """Per-user reference with dot-input quantization matched to the kernel packing
    (sigmoid of the logit difference == softmax(logits)[:, 1])."""
    w1, b1, w2, b2 = params
    batch = rx.shape[0]
    probs = HALF * jnp.ones((batch, n_users), jnp.float32)
    logits = jnp.zeros((batch, n_users), jnp.float32)
    for _ in range(iterations):
        p_cols, l_cols = [], []
        for k in range(n_users):
            idx = jnp.array([j for j in range(n_users) if j != k], jnp.int32)
            x = jnp.concatenate([rx, probs[:, idx]], axis=1).astype(matmul_dtype)
            pre = jnp.dot(x, w1[k].astype(matmul_dtype),
                          preferred_element_type=jnp.float32) + b1[k]
            h = jnp.maximum(pre, 0.0)
            w2d = (w2[k, :, 1] - w2[k, :, 0]).astype(matmul_dtype)
            b2d = b2[k, 0, 1] - b2[k, 0, 0]
            logit = jnp.dot(h.astype(matmul_dtype), w2d,
                            preferred_element_type=jnp.float32) + b2d
            l_cols.append(logit)
            p_cols.append(1.0 / (1.0 + jnp.exp(-logit)))
        probs = jnp.stack(p_cols, axis=1)
        logits = jnp.stack(l_cols, axis=1)
    symbols = jnp.sign(logits)
    return HALF * (1.0 - symbols), probs


if __name__ == "__main__":
    # Small, module-consistent shapes: 256 received words, 4 antennas, 4 users
    # -> a 2-step batch grid with B_TILE=128.
    batch, n_ant, n_users = 256, 4, 4
    in_dim = n_ant + n_users - 1

    key = jax.random.PRNGKey(0)
    k_rx, k_params = jax.random.split(key)
    rx = jax.random.normal(k_rx, (batch, n_ant), jnp.float32)
    params = init_params(k_params, n_users, in_dim, HIDDEN_SIZE)

    detected, probs = trainer_forward(rx, params, n_users)
    jax.block_until_ready((detected, probs))

    ref_det_m, ref_probs_m = _reference_forward_matched(rx, params, n_users)
    _, ref_probs_f = _reference_forward_f32(rx, params, n_users)

    assert detected.shape == (batch, n_users) and probs.shape == (batch, n_users)
    assert jnp.allclose(probs, ref_probs_m, atol=2e-3), "probs mismatch vs matched ref"
    assert jnp.allclose(probs, ref_probs_f, atol=3e-2), "probs mismatch vs f32 ref"
    # Hard decisions must match the matched-precision reference, except possibly at
    # quantization-level borderline symbols (|p - 0.5| < 1e-3) where accumulation
    # order may legitimately flip the coin.
    mism = detected != ref_det_m
    assert bool(jnp.all(jnp.where(mism, jnp.abs(probs - HALF) < 1e-3, True))), \
        "detected mismatch vs matched reference"
    print("KERNEL_OK")
</pallas_src>

<mosaic_0001>
module attributes {stable_mosaic.version = 11 : i64} {
  func.func @_deepsic_fused_kernel(%arg0: i32, %arg1: memref<4x128xf32, #tpu.memory_space<vmem>>, %arg2: memref<128x8xbf16, #tpu.memory_space<vmem>>, %arg3: memref<128x1xf32, #tpu.memory_space<vmem>>, %arg4: memref<4x128xbf16, #tpu.memory_space<vmem>>, %arg5: memref<4x1xf32, #tpu.memory_space<vmem>>, %arg6: memref<4x128xf32, #tpu.memory_space<vmem>>, %arg7: memref<4x128xf32, #tpu.memory_space<vmem>>, %arg8: memref<8x128xf32, #tpu.memory_space<vmem>>) attributes {dimension_semantics = [#tpu.dimension_semantics<parallel>], iteration_bounds = array<i64: 2>, scalar_prefetch = 0 : i64, scratch_operands = 1 : i64, tpu.core_type = #tpu.core_type<tc>, window_params = [{transform_indices = @transform_0, window_bounds = array<i64: 4, 128>}, {pipeline_mode = #tpu.pipeline_mode<synchronous>, transform_indices = @transform_1, window_bounds = array<i64: 128, 8>}, {pipeline_mode = #tpu.pipeline_mode<synchronous>, transform_indices = @transform_2, window_bounds = array<i64: 128, 1>}, {pipeline_mode = #tpu.pipeline_mode<synchronous>, transform_indices = @transform_3, window_bounds = array<i64: 4, 128>}, {pipeline_mode = #tpu.pipeline_mode<synchronous>, transform_indices = @transform_4, window_bounds = array<i64: 4, 1>}, {transform_indices = @transform_5, window_bounds = array<i64: 4, 128>}, {transform_indices = @transform_6, window_bounds = array<i64: 4, 128>}]} {
    %c0 = arith.constant 0 : index
    %c0_0 = arith.constant 0 : index
    %0 = vector.load %arg1[%c0, %c0_0] : memref<4x128xf32, #tpu.memory_space<vmem>>, vector<4x128xf32>
    %c0_1 = arith.constant 0 : index
    %c0_2 = arith.constant 0 : index
    %1 = vector.load %arg8[%c0_1, %c0_2] : memref<8x128xf32, #tpu.memory_space<vmem>>, vector<4x128xf32>
    tpu.vector_store %arg8[%c0_1, %c0_2], %0 {strides = array<i32>} : memref<8x128xf32, #tpu.memory_space<vmem>>, vector<4x128xf32>,
    %cst = arith.constant 5.000000e-01 : f32
    %2 = vector.broadcast %cst : f32 to vector<4x128xf32>
    %c4 = arith.constant 4 : index
    %c0_3 = arith.constant 0 : index
    %3 = vector.load %arg8[%c4, %c0_3] : memref<8x128xf32, #tpu.memory_space<vmem>>, vector<4x128xf32>
    tpu.vector_store %arg8[%c4, %c0_3], %2 {strides = array<i32>} : memref<8x128xf32, #tpu.memory_space<vmem>>, vector<4x128xf32>,
    %c0_4 = arith.constant 0 : index
    %c0_5 = arith.constant 0 : index
    %4 = vector.load %arg2[%c0_4, %c0_5] : memref<128x8xbf16, #tpu.memory_space<vmem>>, vector<128x8xbf16>
    %c0_6 = arith.constant 0 : index
    %c0_7 = arith.constant 0 : index
    %5 = vector.load %arg4[%c0_6, %c0_7] : memref<4x128xbf16, #tpu.memory_space<vmem>>, vector<4x128xbf16>
    %c0_8 = arith.constant 0 : index
    %c0_9 = arith.constant 0 : index
    %6 = vector.load %arg3[%c0_8, %c0_9] : memref<128x1xf32, #tpu.memory_space<vmem>>, vector<128x1xf32>
    %7 = vector.shape_cast %6 : vector<128x1xf32> to vector<128x1xf32>
    %8 = vector.broadcast %7 : vector<128x1xf32> to vector<128x128xf32>
    %c0_10 = arith.constant 0 : index
    %c0_11 = arith.constant 0 : index
    %9 = vector.load %arg5[%c0_10, %c0_11] : memref<4x1xf32, #tpu.memory_space<vmem>>, vector<4x1xf32>
    %10 = vector.shape_cast %9 : vector<4x1xf32> to vector<4x1xf32>
    %11 = vector.broadcast %10 : vector<4x1xf32> to vector<4x128xf32>
    %c0_12 = arith.constant 0 : index
    %c0_13 = arith.constant 0 : index
    %12 = vector.load %arg8[%c0_12, %c0_13] : memref<8x128xf32, #tpu.memory_space<vmem>>, vector<8x128xf32>
    %13 = arith.truncf %12 : vector<8x128xf32> to vector<8x128xbf16>
    %cst_14 = arith.constant dense<0.000000e+00> : vector<128x128xf32>
    %14 = tpu.matmul %4, %13, %cst_14 {dimension_numbers = #tpu.dot_dimension_numbers<[1], [0], [0], [1], [0, 0, 1, 1], [], []>} : vector<128x8xbf16>, vector<8x128xbf16>, vector<128x128xf32> -> vector<128x128xf32>
    %15 = arith.addf %14, %8 : vector<128x128xf32>
    %cst_15 = arith.constant 0.000000e+00 : f32
    %16 = vector.broadcast %cst_15 : f32 to vector<128x128xf32>
    %17 = arith.maximumf %15, %16 : vector<128x128xf32>
    %18 = arith.truncf %17 : vector<128x128xf32> to vector<128x128xbf16>
    %cst_16 = arith.constant dense<0.000000e+00> : vector<4x128xf32>
    %19 = tpu.matmul %5, %18, %cst_16 {dimension_numbers = #tpu.dot_dimension_numbers<[1], [0], [0], [1], [0, 0, 1, 1], [], []>} : vector<4x128xbf16>, vector<128x128xbf16>, vector<4x128xf32> -> vector<4x128xf32>
    %20 = arith.addf %19, %11 : vector<4x128xf32>
    %cst_17 = arith.constant 0.000000e+00 : f32
    %21 = vector.broadcast %cst_17 : f32 to vector<4x128xf32>
    %22 = arith.subf %21, %20 : vector<4x128xf32>
    %23 = math.exp %22 : vector<4x128xf32>
    %cst_18 = arith.constant 1.000000e+00 : f32
    %24 = vector.broadcast %cst_18 : f32 to vector<4x128xf32>
    %25 = arith.addf %24, %23 : vector<4x128xf32>
    %cst_19 = arith.constant 1.000000e+00 : f32
    %26 = vector.broadcast %cst_19 : f32 to vector<4x128xf32>
    %27 = arith.divf %26, %25 : vector<4x128xf32>
    %c4_20 = arith.constant 4 : index
    %c0_21 = arith.constant 0 : index
    %28 = vector.load %arg8[%c4_20, %c0_21] : memref<8x128xf32, #tpu.memory_space<vmem>>, vector<4x128xf32>
    tpu.vector_store %arg8[%c4_20, %c0_21], %27 {strides = array<i32>} : memref<8x128xf32, #tpu.memory_space<vmem>>, vector<4x128xf32>,
    %c0_22 = arith.constant 0 : index
    %c0_23 = arith.constant 0 : index
    %29 = vector.load %arg8[%c0_22, %c0_23] : memref<8x128xf32, #tpu.memory_space<vmem>>, vector<8x128xf32>
    %30 = arith.truncf %29 : vector<8x128xf32> to vector<8x128xbf16>
    %cst_24 = arith.constant dense<0.000000e+00> : vector<128x128xf32>
    %31 = tpu.matmul %4, %30, %cst_24 {dimension_numbers = #tpu.dot_dimension_numbers<[1], [0], [0], [1], [0, 0, 1, 1], [], []>} : vector<128x8xbf16>, vector<8x128xbf16>, vector<128x128xf32> -> vector<128x128xf32>
    %32 = arith.addf %31, %8 : vector<128x128xf32>
    %cst_25 = arith.constant 0.000000e+00 : f32
    %33 = vector.broadcast %cst_25 : f32 to vector<128x128xf32>
    %34 = arith.maximumf %32, %33 : vector<128x128xf32>
    %35 = arith.truncf %34 : vector<128x128xf32> to vector<128x128xbf16>
    %cst_26 = arith.constant dense<0.000000e+00> : vector<4x128xf32>
    %36 = tpu.matmul %5, %35, %cst_26 {dimension_numbers = #tpu.dot_dimension_numbers<[1], [0], [0], [1], [0, 0, 1, 1], [], []>} : vector<4x128xbf16>, vector<128x128xbf16>, vector<4x128xf32> -> vector<4x128xf32>
    %37 = arith.addf %36, %11 : vector<4x128xf32>
    %cst_27 = arith.constant 0.000000e+00 : f32
    %38 = vector.broadcast %cst_27 : f32 to vector<4x128xf32>
    %39 = arith.subf %38, %37 : vector<4x128xf32>
    %40 = math.exp %39 : vector<4x128xf32>
    %cst_28 = arith.constant 1.000000e+00 : f32
    %41 = vector.broadcast %cst_28 : f32 to vector<4x128xf32>
    %42 = arith.addf %41, %40 : vector<4x128xf32>
    %cst_29 = arith.constant 1.000000e+00 : f32
    %43 = vector.broadcast %cst_29 : f32 to vector<4x128xf32>
    %44 = arith.divf %43, %42 : vector<4x128xf32>
    %c4_30 = arith.constant 4 : index
    %c0_31 = arith.constant 0 : index
    %45 = vector.load %arg8[%c4_30, %c0_31] : memref<8x128xf32, #tpu.memory_space<vmem>>, vector<4x128xf32>
    tpu.vector_store %arg8[%c4_30, %c0_31], %44 {strides = array<i32>} : memref<8x128xf32, #tpu.memory_space<vmem>>, vector<4x128xf32>,
    %c0_32 = arith.constant 0 : index
    %c0_33 = arith.constant 0 : index
    %46 = vector.load %arg8[%c0_32, %c0_33] : memref<8x128xf32, #tpu.memory_space<vmem>>, vector<8x128xf32>
    %47 = arith.truncf %46 : vector<8x128xf32> to vector<8x128xbf16>
    %cst_34 = arith.constant dense<0.000000e+00> : vector<128x128xf32>
    %48 = tpu.matmul %4, %47, %cst_34 {dimension_numbers = #tpu.dot_dimension_numbers<[1], [0], [0], [1], [0, 0, 1, 1], [], []>} : vector<128x8xbf16>, vector<8x128xbf16>, vector<128x128xf32> -> vector<128x128xf32>
    %49 = arith.addf %48, %8 : vector<128x128xf32>
    %cst_35 = arith.constant 0.000000e+00 : f32
    %50 = vector.broadcast %cst_35 : f32 to vector<128x128xf32>
    %51 = arith.maximumf %49, %50 : vector<128x128xf32>
    %52 = arith.truncf %51 : vector<128x128xf32> to vector<128x128xbf16>
    %cst_36 = arith.constant dense<0.000000e+00> : vector<4x128xf32>
    %53 = tpu.matmul %5, %52, %cst_36 {dimension_numbers = #tpu.dot_dimension_numbers<[1], [0], [0], [1], [0, 0, 1, 1], [], []>} : vector<4x128xbf16>, vector<128x128xbf16>, vector<4x128xf32> -> vector<4x128xf32>
    %54 = arith.addf %53, %11 : vector<4x128xf32>
    %cst_37 = arith.constant 0.000000e+00 : f32
    %55 = vector.broadcast %cst_37 : f32 to vector<4x128xf32>
    %56 = arith.subf %55, %54 : vector<4x128xf32>
    %57 = math.exp %56 : vector<4x128xf32>
    %cst_38 = arith.constant 1.000000e+00 : f32
    %58 = vector.broadcast %cst_38 : f32 to vector<4x128xf32>
    %59 = arith.addf %58, %57 : vector<4x128xf32>
    %cst_39 = arith.constant 1.000000e+00 : f32
    %60 = vector.broadcast %cst_39 : f32 to vector<4x128xf32>
    %61 = arith.divf %60, %59 : vector<4x128xf32>
    %c0_40 = arith.constant 0 : index
    %c0_41 = arith.constant 0 : index
    %62 = vector.load %arg7[%c0_40, %c0_41] : memref<4x128xf32, #tpu.memory_space<vmem>>, vector<4x128xf32>
    tpu.vector_store %arg7[%c0_40, %c0_41], %61 {strides = array<i32>} : memref<4x128xf32, #tpu.memory_space<vmem>>, vector<4x128xf32>,
    %cst_42 = arith.constant 0.000000e+00 : f32
    %63 = vector.broadcast %cst_42 : f32 to vector<4x128xf32>
    %64 = arith.cmpf ogt, %54, %63 : vector<4x128xf32>
    %cst_43 = arith.constant 0.000000e+00 : f32
    %65 = vector.broadcast %cst_43 : f32 to vector<4x128xf32>
    %66 = arith.cmpf olt, %54, %65 : vector<4x128xf32>
    %cst_44 = arith.constant -1.000000e+00 : f32
    %cst_45 = arith.constant 0.000000e+00 : f32
    %67 = vector.broadcast %cst_44 : f32 to vector<4x128xf32>
    %68 = vector.broadcast %cst_45 : f32 to vector<4x128xf32>
    %69 = arith.select %66, %67, %68 : vector<4x128xi1>, vector<4x128xf32>
    %cst_46 = arith.constant 1.000000e+00 : f32
    %70 = vector.broadcast %cst_46 : f32 to vector<4x128xf32>
    %71 = arith.select %64, %70, %69 : vector<4x128xi1>, vector<4x128xf32>
    %cst_47 = arith.constant 1.000000e+00 : f32
    %72 = vector.broadcast %cst_47 : f32 to vector<4x128xf32>
    %73 = arith.subf %72, %71 : vector<4x128xf32>
    %cst_48 = arith.constant 5.000000e-01 : f32
    %74 = vector.broadcast %cst_48 : f32 to vector<4x128xf32>
    %75 = arith.mulf %74, %73 : vector<4x128xf32>
    %c0_49 = arith.constant 0 : index
    %c0_50 = arith.constant 0 : index
    %76 = vector.load %arg6[%c0_49, %c0_50] : memref<4x128xf32, #tpu.memory_space<vmem>>, vector<4x128xf32>
    tpu.vector_store %arg6[%c0_49, %c0_50], %75 {strides = array<i32>} : memref<4x128xf32, #tpu.memory_space<vmem>>, vector<4x128xf32>,
    return
  }
  func.func @transform_0(%arg0: i32) -> (i32, i32) {
    %c0_i32 = arith.constant 0 : i32
    %c0_i32_0 = arith.constant 0 : i32
    return %c0_i32, %arg0 : i32, i32
  }
  func.func @transform_1(%arg0: i32) -> (i32, i32) {
    %c0_i32 = arith.constant 0 : i32
    %c0_i32_0 = arith.constant 0 : i32
    %c0_i32_1 = arith.constant 0 : i32
    return %c0_i32, %c0_i32_0 : i32, i32
  }
  func.func @transform_2(%arg0: i32) -> (i32, i32) {
    %c0_i32 = arith.constant 0 : i32
    %c0_i32_0 = arith.constant 0 : i32
    %c0_i32_1 = arith.constant 0 : i32
    return %c0_i32, %c0_i32_0 : i32, i32
  }
  func.func @transform_3(%arg0: i32) -> (i32, i32) {
    %c0_i32 = arith.constant 0 : i32
    %c0_i32_0 = arith.constant 0 : i32
    %c0_i32_1 = arith.constant 0 : i32
    return %c0_i32, %c0_i32_0 : i32, i32
  }
  func.func @transform_4(%arg0: i32) -> (i32, i32) {
    %c0_i32 = arith.constant 0 : i32
    %c0_i32_0 = arith.constant 0 : i32
    %c0_i32_1 = arith.constant 0 : i32
    return %c0_i32, %c0_i32_0 : i32, i32
  }
  func.func @transform_5(%arg0: i32) -> (i32, i32) {
    %c0_i32 = arith.constant 0 : i32
    %c0_i32_0 = arith.constant 0 : i32
    return %c0_i32, %arg0 : i32, i32
  }
  func.func @transform_6(%arg0: i32) -> (i32, i32) {
    %c0_i32 = arith.constant 0 : i32
    %c0_i32_0 = arith.constant 0 : i32
    return %c0_i32, %arg0 : i32, i32
  }
}

</mosaic_0001>

<bundles_post_ra>
// kernel: tpu_custom_call.1
= control target key start
LH: loop header
LB: loop body
LE: loop exit
PB: predicated region body
PF: predicated region fallthrough
CT: control target
= control target key end

     0   :  { %12 = vsyncpa [#allocation4], 0  ;;  %s1914_s0 = inlined_call_operand.vmem [shape: f32[4,256], index: 0, kind: input, shape index: {}]   ;;  %s1915_s1 = inlined_call_operand.vmem [shape: bf16[128,8], index: 1, kind: input, shape index: {}]   ;;  %s1916_s2 = inlined_call_operand.vmem [shape: f32[128,1], index: 2, kind: input, shape index: {}]   ;;  %s1917_s3 = inlined_call_operand.vmem [shape: bf16[4,128], index: 3, kind: input, shape index: {}]   ;;  %s1918_s4 = inlined_call_operand.vmem [shape: f32[4,1], index: 4, kind: input, shape index: {}]   ;;  %s1919_s5 = inlined_call_operand.hbm [shape: f32[4,256], index: 5, kind: output, shape index: {0}]   ;;  %s1920_s6 = inlined_call_operand.hbm [shape: f32[4,256], index: 6, kind: output, shape index: {1}]  }
   0x1   :  { %14 = vsyncpa [#allocation4 + $0x1], 0 }
   0x2   :  { %15 = vsyncpa [#allocation6], 0 }
   0x3   :  { %17 = vsyncpa [#allocation6 + $0x1], 0  ;;  %s1515_s21 = smov 0   ;;  %s1517_s22 = smov 0  }
   0x4   :  { %s1519_s23 = smov 0   ;;  %s1521_s24 = smov 0  }
   0x5 LB: > { %s1536_s25 = sadd.s32 4294967295, %s1472_s24   ;;  %s1096_s26 = sadd.s32 4294967294, %s1472_s24   ;;  %s1472_s24 = sphi %s1521_s24, %s1928_s24   ;;  %s1468_s23 = sphi %s1519_s23, %s1927_s23   ;;  %s1464_s22 = sphi %s1517_s22, %s1926_s22   ;;  %s1460_s21 = sphi %s1515_s21, %s1925_s21  }
   0x6   : > { %s1540_s27 = sadd.s32 1, %s1472_s24   ;;  %s140_s28 = sadd.s32 1, %s1468_s23 }
   0x7   : > { %s137_s29 = ssub.s32 %s1472_s24, %s1540_s27  ;;  %p150_p0 = scmp.ne.s32.totalorder %s1468_s23, %s1464_s22 }
   0x8   : > { %p138_p1 = scmp.eq.s32.totalorder %s137_s29, 0  ;;  %p151_p2 = scmp.eq.s32.totalorder %s1536_s25, 1 }
   0x9   : > { %p156_p3 = scmp.ne.s32.totalorder %s1464_s22, %s1460_s21  ;;  %p157_p4 = scmp.eq.s32.totalorder %s1096_s26, 1 }
   0xa   : > { %s1551_s30 = scalar_select %p138_p1, %s1468_s23, %s140_s28  }
   0xb   : > { %p1553_p5 = por %p151_p2, %p150_p0  ;;  %p1557_p6 = por %p157_p4, %p156_p3 }
   0xc   : > { %p1099_p7 = scmp.ge.s32.totalorder %s1472_s24, 1  ;;  %p220_p8 = scmp.lt.s32.totalorder %s1472_s24, 3 }
   0xe   : > { %p221_p9 = pnand %p1099_p7, %p220_p8 }
   0xf   : > { %p254_p10 = scmp.lt.s32.totalorder (!%p221_p9), %s1536_s25, 1  ;;  %s1845_s26 = sand.u32 (!%p221_p9), 1, %s1464_s22  }
  0x10   : > { %224 = sbr.rel (%p221_p9) target bundleno = 1544 (0x608), region = 40  ;;  %s1100_s28 = sshll.u32 (!%p221_p9), %s1845_s26, 2 }
  0x11   : > { %s1921_s29 = sshll.u32 (!%p221_p9), %s1536_s25, 6  ;;  %s246_s9 = scalar_lea.vmem (!%p221_p9), [#allocation3], %s1100_s28 }
  0x12   : > { %s992_s10 = sshll.u32 (!%p221_p9), %s246_s9, 4  ;;  %s990_s13 = scalar_lea.hbm (!%p221_p9), %s1919_s5, %s1921_s29  ;;  %s993_s10 = int_to_ptr.vmem [resolvable:$true] %s992_s10 }
  0x13   : > { %s974_s14 = scalar_lea.sflag (!%p221_p9), [#allocation4], %s1845_s26  ;;  %s1478_s16 = smov (!%p221_p9), [#allocation3]  }
  0x14   : > { %s1386_s17 = sshll.u32 (!%p221_p9), %s1478_s16, 4  ;;  %s1387_s17 = int_to_ptr.vmem [resolvable:$false] %s1386_s17 }
  0x15   : > { %v1567_v0 = vld [vmem:[%s1915_s1] sm:$0xff]   ;;  %v1474_v1 = vmov 0.5   ;;  %vm423_vm0 = vcmask 64512   ;;  %s255_s11 = scalar_select %p254_p10, %s1536_s25, 1  ;;  %v1475_v3 = vmov 0   ;;  %v293_v4 = vld [vmem:[%s1916_s2 + $0x70] sm:$0xff] }
  0x16   : > { %261 = vst [vmem:[#allocation2 + $0x4] sm:$0xf] %v1474_v1  ;;  %1197 = vmatprep.mubr.msk.bf16.mxu0 %vm423_vm0, %v1567_v0  ;;  %1360 = vset.pattern.permute.xlu0 %v1475_v3  ;;  %v291_v5 = vld [vmem:[%s1916_s2 + $0x60] sm:$0xff]  ;;  %v294_v6 = vld [vmem:[%s1916_s2 + $0x78] sm:$0xff]  ;;  %v292_v7 = vld [vmem:[%s1916_s2 + $0x68] sm:$0xff]  ;;  %vm448_vm1 = vcmask 1043456   ;;  %p1389_p0 = scmp.lt.s32.totalorder %s993_s10, %s1387_s17 }
  0x17   : > { %s1102_s12 = sshll.u32 %s255_s11, 2  ;;  %1361 = vset.pattern.permute.xlu1 %v1475_v3  ;;  %367 = vperm.xlu0 %1360, %v293_v4   ;;  %v289_v9 = vld [vmem:[%s1916_s2 + $0x50] sm:$0xff]  ;;  %v290_v11 = vld [vmem:[%s1916_s2 + $0x58] sm:$0xff]  ;;  %v1598_v13 = vld [vmem:[%s1915_s1 + $0x8] sm:$0xff]   ;;  %v1476_v31 = vmov 0.0   ;;  %vm1477_vm2 = vmmov 0  }
  0x18   : > { %s257_s15 = scalar_lea.vmem %s1914_s0, %s1102_s12  ;;  %357 = vperm.xlu1 %1361, %v291_v5   ;;  %v1603_v14 = vld [vmem:[%s1915_s1 + $0x10] sm:$0xff]   ;;  %v287_v15 = vld [vmem:[%s1916_s2 + $0x40] sm:$0xff]  ;;  %v288_v16 = vld [vmem:[%s1916_s2 + $0x48] sm:$0xff]  ;;  %1213 = vmatprep.subr.bf16.mxu1 %v1476_v31  ;;  %s1388_s18 = scalar_lea.vmem %s1387_s17, 128 }
  0x19   : > { %v259_v2 = vld [vmem:[%s257_s15] sm:$0xf]  ;;  %v285_v17 = vld [vmem:[%s1916_s2 + $0x30] sm:$0xff]  ;;  %v286_v18 = vld [vmem:[%s1916_s2 + $0x38] sm:$0xff]  ;;  %1229 = vmatprep.mubr.msk.bf16.mxu1 %vm1477_vm2, %v1476_v31  ;;  %s1382_s15 = scalar_lea.vmem %s993_s10, 64 }
  0x1a   : > { %260 = vst [vmem:[#allocation2] sm:$0xf] %v259_v2  ;;  %v1624_v19 = vld [vmem:[%s1915_s1 + $0x18] sm:$0xff]   ;;  %v1629_v20 = vld [vmem:[%s1915_s1 + $0x20] sm:$0xff]   ;;  %v284_v22 = vld [vmem:[%s1916_s2 + $0x28] sm:$0xff]  ;;  %p1383_p11 = scmp.ne.s32.totalorder %s993_s10, %s1382_s15  ;;  %p1390_p1 = scmp.lt.s32.totalorder %s1388_s18, %s1382_s15 }
  0x1b   : > { %372 = vperm.xlu0 %1360, %v294_v6   ;;  %v283_v21 = vld [vmem:[%s1916_s2 + $0x20] sm:$0xff]  ;;  %v281_v23 = vld [vmem:[%s1916_s2 + $0x10] sm:$0xff]  ;;  %v282_v24 = vld [vmem:[%s1916_s2 + $0x18] sm:$0xff] }
  0x1c   : > { %362 = vperm.xlu1 %1361, %v292_v7   ;;  %v1650_v25 = vld [vmem:[%s1915_s1 + $0x28] sm:$0xff]   ;;  %v1655_v26 = vld [vmem:[%s1915_s1 + $0x30] sm:$0xff]   ;;  %v279_v27 = vld [vmem:[%s1916_s2] sm:$0xff]  ;;  %p1384_p12 = pnand %p1383_p11, %p1553_p5  ;;  %p1391_p2 = por %p1390_p1, %p1389_p0 }
  0x1d   : > { %v280_v28 = vld [vmem:[%s1916_s2 + $0x8] sm:$0xff]  ;;  %v375_v29 = vld [vmem:[%s1918_s4] sm:$0xf]  ;;  %v1673_v30 = vld [vmem:[%s1915_s1 + $0x38] sm:$0xff]  }
  0x1e   : > { %p1385_p13 = pneg %p1384_p12 }
  0x1f   : > { %347 = vperm.xlu0 %1360, %v289_v9  }
  0x20   : > { %352 = vperm.xlu1 %1361, %v290_v11   ;;  %p1392_p3 = pnand %p1391_p2, %p1385_p13 }
  0x21   : > { %v381_v8 = vld [vmem:[#allocation2] sm:$0xff] }
  0x22   : > { %v382_v10 = vpack.c.bf16 %v381_v8, %v381_v8 }
  0x23   : > { %337 = vperm.xlu0 %1360, %v287_v15  }
  0x24   : > { %1309 = vmatprep.subr.msk.bf16.mxu0 %vm448_vm1, %v382_v10  ;;  %v450_v12 = vsel %vm448_vm1, %v382_v10, 0  ;;  %342 = vperm.xlu1 %1361, %v288_v16  }
  0x25   : > { %1196 = vmatpush3.bf16.msra.mxu0 %v450_v12 }
  0x27   : > { %327 = vperm.xlu0 %1360, %v285_v17  }
  0x28   : > { %1198 = vmatmul.mubr.msk.bf16.vlgmr.msra.gmra.mxu0 %vm423_vm0, %v1598_v13  ;;  %332 = vperm.xlu1 %1361, %v286_v18  }
  0x29   : > { %1201 = vmatprep.mubr.msk.bf16.mxu0 %vm423_vm0, %v1603_v14 }
  0x2b   : > { %317 = vperm.xlu0 %1360, %v283_v21  }
  0x2c   : > { %322 = vperm.xlu1 %1361, %v284_v22  }
  0x2f   : > { %307 = vperm.xlu0 %1360, %v281_v23  }
  0x30   : > { %1202 = vmatmul.mubr.msk.bf16.gmra.mxu0 %vm423_vm0, %v1624_v19  ;;  %312 = vperm.xlu1 %1361, %v282_v24  }
  0x31   : > { %1205 = vmatprep.mubr.msk.bf16.mxu0 %vm423_vm0, %v1629_v20 }
  0x33   : > { %297 = vperm.xlu0 %1360, %v279_v27  }
  0x34   : > { %302 = vperm.xlu1 %1361, %v280_v28  }
  0x37   : > { %378 = vperm.xlu0 %1360, %v375_v29  }
  0x38   : > { %1206 = vmatmul.mubr.msk.bf16.gmra.mxu0 %vm423_vm0, %v1650_v25 }
  0x39   : > { %1209 = vmatprep.mubr.msk.bf16.mxu0 %vm423_vm0, %v1655_v26 }
  0x40   : > { %1210 = vmatmul.mubr.msk.bf16.gmra.mxu0 %vm423_vm0, %v1673_v30 }
  0x41   : > { %1235 = vmatprep.mubr.msk.bf16.mxu0 %vm423_vm0, %v1567_v0 }
  0x92   : > { %v1690_v38 = vpop.permute.xlu0 %367 }
  0x93   : > { %v1688_v36 = vpop.permute.xlu1 %357 }
  0x96   : > { %v1694_v43 = vpop.permute.xlu0 %372 }
  0x97   : > { %v1692_v41 = vpop.permute.xlu1 %362 }
  0x9a   : > { %v1698_v48 = vpop.permute.xlu0 %347 }
  0x9b   : > { %v1696_v46 = vpop.permute.xlu1 %352 }
  0x9e   : > { %v1703_v54 = vpop.permute.xlu0 %337 }
  0x9f   : > { %v1700_v51 = vpop.permute.xlu1 %342 }
  0xa2   : > { %v1711_v3 = vpop.permute.xlu0 %327 }
  0xa3   : > { %v1708_v62 = vpop.permute.xlu1 %332 }
  0xa6   : > { %v1719_v12 = vpop.permute.xlu0 %317 }
  0xa7   : > { %v1716_v9 = vpop.permute.xlu1 %322 }
  0xaa   : > { %v1728_v28 = vpop.permute.xlu0 %307 }
  0xab   : > { %v1724_v22 = vpop.permute.xlu1 %312 }
  0xe8   : > { %v1682_v32 = vpop.f32.mrf.mxu0 }
  0xea   : > { %v1684_v33 = vpop.f32.mrf.mxu0 }
  0xec   : > { %v1200_v34 = vpop.f32.mrf.mxu0 }
  0xee   : > { %v1686_v35 = vpop.f32.mrf.mxu0 }
  0xf0   : > { %v1203_v37 = vpop.f32.mrf.mxu0 }
  0xf1   : > { %v511_v18 = vadd.f32 %v1203_v37, %v1711_v3  ;;  %v498_v37 = vadd.f32 %v1200_v34, %v1724_v22 }
  0xf2   : > { %v502_v39 = vpop.f32.mrf.mxu0 }
  0xf3   : > { %v555_v29 = vmax.f32 %v511_v18, 0.0 }
  0xf4   : > { %v1204_v40 = vpop.f32.mrf.mxu0 }
  0xf5   : > { %v514_v15 = vadd.f32 %v1204_v40, %v1708_v62 }
  0xf6   : > { %v505_v42 = vpop.f32.mrf.mxu0 }
  0xf7   : > { %v556_v23 = vmax.f32 %v514_v15, 0.0  ;;  %v506_v24 = vadd.f32 %v505_v42, %v1716_v9  ;;  %v1737_v42 = vpop.permute.xlu0 %297 }
  0xf8   : > { %v1207_v44 = vpop.f32.mrf.mxu0  ;;  %v487_v34 = vadd.f32 %v1684_v33, %v1737_v42 }
  0xf9   : > { %v527_v4 = vadd.f32 %v1207_v44, %v1698_v48  ;;  %v503_v44 = vadd.f32 %v502_v39, %v1719_v12  ;;  %v568_v40 = vpack.c.bf16 %v556_v23, %v555_v29 }
  0xfa   : > { %v518_v45 = vpop.f32.mrf.mxu0 }
  0xfb   : > { %v559_v10 = vmax.f32 %v527_v4, 0.0  ;;  %v519_v11 = vadd.f32 %v518_v45, %v1703_v54  ;;  %v554_v45 = vmax.f32 %v506_v24, 0.0  ;;  %v1755_v33 = vpop.permute.xlu0 %378 }
  0xfc   : > { %v1208_v47 = vpop.f32.mrf.mxu0 }
  0xfd   : > { %v530_v63 = vadd.f32 %v1208_v47, %v1696_v46  ;;  %v557_v21 = vmax.f32 %v519_v11, 0.0  ;;  %v1733_v47 = vpop.permute.xlu1 %302 }
  0xfe   : > { %v521_v49 = vpop.f32.mrf.mxu0  ;;  %v490_v39 = vadd.f32 %v1686_v35, %v1733_v47  ;;  %v1749_v35 = vld [vmem:[%s1917_s3] sm:$0x3] }
  0xff   : > { %v560_v6 = vmax.f32 %v530_v63, 0.0  ;;  %v522_v7 = vadd.f32 %v521_v49, %v1700_v51  ;;  %v495_v49 = vadd.f32 %v1682_v32, %v1728_v28 }
 0x100   : > { %v1211_v50 = vpop.f32.mrf.mxu0  ;;  %v550_v32 = vmax.f32 %v490_v39, 0.0 }
 0x101   : > { %v543_v53 = vadd.f32 %v1211_v50, %v1690_v38  ;;  %v570_v16 = vpack.c.bf16 %v560_v6, %v559_v10  ;;  %v558_v17 = vmax.f32 %v522_v7, 0.0  ;;  %v553_v50 = vmax.f32 %v503_v44, 0.0 }
 0x102   : > { %v534_v52 = vpop.f32.mrf.mxu0 }
 0x103   : > { %v563_v58 = vmax.f32 %v543_v53, 0.0  ;;  %v535_v59 = vadd.f32 %v534_v52, %v1688_v36  ;;  %v569_v27 = vpack.c.bf16 %v558_v17, %v557_v21  ;;  %v552_v52 = vmax.f32 %v498_v37, 0.0 }
 0x104   : > { %v1212_v55 = vpop.f32.mrf.mxu0  ;;  %v567_v53 = vpack.c.bf16 %v554_v45, %v553_v50 }
 0x105   : > { %v546_v56 = vadd.f32 %v1212_v55, %v1694_v43  ;;  %v561_v5 = vmax.f32 %v535_v59, 0.0  ;;  %v551_v55 = vmax.f32 %v495_v49, 0.0 }
 0x106   : > { %v537_v57 = vpop.f32.mrf.mxu0 }
 0x107   : > { %v564_v60 = vmax.f32 %v546_v56, 0.0  ;;  %v538_v61 = vadd.f32 %v537_v57, %v1692_v41  ;;  %v566_v56 = vpack.c.bf16 %v552_v52, %v551_v55  ;;  %v549_v57 = vmax.f32 %v487_v34, 0.0 }
 0x109   : > { %v562_v1 = vmax.f32 %v538_v61, 0.0  ;;  %v572_v2 = vpack.c.bf16 %v564_v60, %v563_v58  ;;  %v565_v58 = vpack.c.bf16 %v550_v32, %v549_v57 }
 0x10b   : > { %1214 = vmatpush3.bf16.msra.mxu1 %v572_v2  ;;  %v571_v8 = vpack.c.bf16 %v562_v1, %v561_v5 }
 0x10c   : > { %1215 = vmatprep.subr.bf16.mxu1 %v1476_v31 }
 0x10f   : > { %1216 = vmatpush3.bf16.msra.mxu1 %v571_v8 }
 0x110   : > { %1217 = vmatprep.subr.bf16.mxu1 %v1476_v31 }
 0x113   : > { %1218 = vmatpush3.bf16.msra.mxu1 %v570_v16 }
 0x114   : > { %1219 = vmatprep.subr.bf16.mxu1 %v1476_v31 }
 0x117   : > { %1220 = vmatpush3.bf16.msra.mxu1 %v569_v27 }
 0x118   : > { %1221 = vmatprep.subr.bf16.mxu1 %v1476_v31 }
 0x11b   : > { %1222 = vmatpush3.bf16.msra.mxu1 %v568_v40 }
 0x11c   : > { %1223 = vmatprep.subr.bf16.mxu1 %v1476_v31 }
 0x11f   : > { %1224 = vmatpush3.bf16.msra.mxu1 %v567_v53 }
 0x120   : > { %1225 = vmatprep.subr.bf16.mxu1 %v1476_v31 }
 0x123   : > { %1226 = vmatpush3.bf16.msra.mxu1 %v566_v56 }
 0x124   : > { %1227 = vmatprep.subr.bf16.mxu1 %v1476_v31 }
 0x127   : > { %1228 = vmatpush3.bf16.msra.mxu1 %v565_v58 }
 0x128   : > { %1251 = vmatprep.subr.bf16.mxu1 %v1476_v31 }
 0x12a   : > { %1230 = vmatmul.mubr.bf16.vlgmr.msra.gmra.mxu1 %v1749_v35 }
 0x12b   : > { %1267 = vmatprep.mubr.msk.bf16.mxu1 %vm1477_vm2, %v1476_v31 }
 0x1ea   : > { %v607_v59 = vpop.f32.mrf.mxu1 }
 0x1eb   : > { %v608_v60 = vadd.f32 %v607_v59, %v1755_v33 }
 0x1ec   : > { %v1231_v61 = vpop.f32.mrf.mxu1 }
 0x1ed   : > { %v613_v63 = vsub.f32 0.0, %v608_v60 }
 0x1ee   : > { %v610_v1 = vpop.f32.mrf.mxu1 }
 0x1ef   : > { %v614_v2 = vmul.f32 1.442695, %v613_v63 }
 0x1f0   : > { %v1232_v4 = vpop.f32.mrf.mxu1 }
 0x1f1   : > { %1370 = vpow2.f32 %v614_v2 }
 0x1fe   : > { %v1371_v5 = vpop.eup %1370 }
 0x1ff   : > { %v616_v6 = vadd.f32 1.0, %v1371_v5 }
 0x201   : > { %1372 = vrcp.f32 %v616_v6 }
 0x20e   : > { %v1373_v7 = vpop.eup %1372 }
 0x20f   : > { %619 = vst [vmem:[#allocation2 + $0x4] sm:$0xf] %v1373_v7 }
 0x216   : > { %v620_v8 = vld [vmem:[#allocation2] sm:$0xff] }
 0x217   : > { %v621_v10 = vpack.c.bf16 %v620_v8, %v620_v8 }
 0x219   : > { %1310 = vmatprep.subr.msk.bf16.mxu0 %vm448_vm1, %v621_v10  ;;  %v623_v11 = vsel %vm448_vm1, %v621_v10, 0 }
 0x21a   : > { %1234 = vmatpush3.bf16.msra.mxu0 %v623_v11 }
 0x21d   : > { %1236 = vmatmul.mubr.msk.bf16.vlgmr.msra.gmra.mxu0 %vm423_vm0, %v1598_v13 }
 0x21e   : > { %1239 = vmatprep.mubr.msk.bf16.mxu0 %vm423_vm0, %v1603_v14 }
 0x225   : > { %1240 = vmatmul.mubr.msk.bf16.gmra.mxu0 %vm423_vm0, %v1624_v19 }
 0x226   : > { %1243 = vmatprep.mubr.msk.bf16.mxu0 %vm423_vm0, %v1629_v20 }
 0x22d   : > { %1244 = vmatmul.mubr.msk.bf16.gmra.mxu0 %vm423_vm0, %v1650_v25 }
 0x22e   : > { %1247 = vmatprep.mubr.msk.bf16.mxu0 %vm423_vm0, %v1655_v26 }
 0x235   : > { %1248 = vmatmul.mubr.msk.bf16.gmra.mxu0 %vm423_vm0, %v1673_v30 }
 0x236   : > { %1273 = vmatprep.mubr.msk.bf16.mxu0 %vm423_vm0, %v1567_v0 }
 0x2dd   : > { %v1237_v15 = vpop.f32.mrf.mxu0 }
 0x2df   : > { %v659_v16 = vpop.f32.mrf.mxu0 }
 0x2e1   : > { %v1238_v17 = vpop.f32.mrf.mxu0 }
 0x2e3   : > { %v662_v18 = vpop.f32.mrf.mxu0 }
 0x2e5   : > { %v1241_v21 = vpop.f32.mrf.mxu0 }
 0x2e6   : > { %v684_v8 = vadd.f32 %v1241_v21, %v1711_v3  ;;  %v668_v21 = vadd.f32 %v1237_v15, %v1728_v28 }
 0x2e7   : > { %v675_v23 = vpop.f32.mrf.mxu0 }
 0x2e9   : > { %v1242_v24 = vpop.f32.mrf.mxu0 }
 0x2ea   : > { %v687_v5 = vadd.f32 %v1242_v24, %v1708_v62  ;;  %v671_v24 = vadd.f32 %v1238_v17, %v1724_v22 }
 0x2eb   : > { %v678_v27 = vpop.f32.mrf.mxu0 }
 0x2ec   : > { %v729_v11 = vmax.f32 %v687_v5, 0.0 }
 0x2ed   : > { %v1245_v29 = vpop.f32.mrf.mxu0 }
 0x2ee   : > { %v700_v59 = vadd.f32 %v1245_v29, %v1698_v48  ;;  %v679_v29 = vadd.f32 %v678_v27, %v1716_v9  ;;  %v663_v27 = vadd.f32 %v662_v18, %v1733_v47 }
 0x2ef   : > { %v691_v44 = vpop.f32.mrf.mxu0 }
 0x2f0   : > { %v732_v2 = vmax.f32 %v700_v59, 0.0  ;;  %v692_v4 = vadd.f32 %v691_v44, %v1703_v54  ;;  %v676_v44 = vadd.f32 %v675_v23, %v1719_v12  ;;  %v660_v23 = vadd.f32 %v659_v16, %v1737_v42 }
 0x2f1   : > { %v1246_v37 = vpop.f32.mrf.mxu0  ;;  %v723_v17 = vmax.f32 %v663_v27, 0.0 }
 0x2f2   : > { %v703_v32 = vadd.f32 %v1246_v37, %v1696_v46  ;;  %v730_v10 = vmax.f32 %v692_v4, 0.0 }
 0x2f3   : > { %v694_v40 = vpop.f32.mrf.mxu0 }
 0x2f4   : > { %v733_v61 = vmax.f32 %v703_v32, 0.0  ;;  %v695_v63 = vadd.f32 %v694_v40, %v1700_v51  ;;  %v728_v40 = vmax.f32 %v684_v8, 0.0 }
 0x2f5   : > { %v1249_v45 = vpop.f32.mrf.mxu0 }
 0x2f6   : > { %v716_v50 = vadd.f32 %v1249_v45, %v1690_v38  ;;  %v743_v6 = vpack.c.bf16 %v733_v61, %v732_v2  ;;  %v731_v7 = vmax.f32 %v695_v63, 0.0  ;;  %v741_v45 = vpack.c.bf16 %v729_v11, %v728_v40 }
 0x2f7   : > { %v707_v49 = vpop.f32.mrf.mxu0 }
 0x2f8   : > { %v736_v53 = vmax.f32 %v716_v50, 0.0  ;;  %v708_v55 = vadd.f32 %v707_v49, %v1688_v36  ;;  %v742_v37 = vpack.c.bf16 %v731_v7, %v730_v10  ;;  %v727_v49 = vmax.f32 %v679_v29, 0.0 }
 0x2f9   : > { %v1250_v52 = vpop.f32.mrf.mxu0  ;;  %v726_v50 = vmax.f32 %v676_v44, 0.0 }
 0x2fa   : > { %v719_v39 = vadd.f32 %v1250_v52, %v1694_v43  ;;  %v734_v60 = vmax.f32 %v708_v55, 0.0  ;;  %v725_v52 = vmax.f32 %v671_v24, 0.0  ;;  %v722_v55 = vmax.f32 %v660_v23, 0.0 }
 0x2fb   : > { %v710_v0 = vpop.f32.mrf.mxu0 }
 0x2fc   : > { %v737_v34 = vmax.f32 %v719_v39, 0.0  ;;  %v711_v56 = vadd.f32 %v710_v0, %v1692_v41  ;;  %v740_v39 = vpack.c.bf16 %v727_v49, %v726_v50  ;;  %v724_v0 = vmax.f32 %v668_v21, 0.0 }
 0x2fd   : > { %v738_v15 = vpack.c.bf16 %v723_v17, %v722_v55 }
 0x2fe   : > { %v745_v57 = vpack.c.bf16 %v737_v34, %v736_v53  ;;  %v735_v58 = vmax.f32 %v711_v56, 0.0  ;;  %v739_v53 = vpack.c.bf16 %v725_v52, %v724_v0 }
 0x300   : > { %1252 = vmatpush3.bf16.msra.mxu1 %v745_v57  ;;  %v744_v1 = vpack.c.bf16 %v735_v58, %v734_v60 }
 0x301   : > { %1253 = vmatprep.subr.bf16.mxu1 %v1476_v31 }
 0x304   : > { %1254 = vmatpush3.bf16.msra.mxu1 %v744_v1 }
 0x305   : > { %1255 = vmatprep.subr.bf16.mxu1 %v1476_v31 }
 0x308   : > { %1256 = vmatpush3.bf16.msra.mxu1 %v743_v6 }
 0x309   : > { %1257 = vmatprep.subr.bf16.mxu1 %v1476_v31 }
 0x30c   : > { %1258 = vmatpush3.bf16.msra.mxu1 %v742_v37 }
 0x30d   : > { %1259 = vmatprep.subr.bf16.mxu1 %v1476_v31 }
 0x310   : > { %1260 = vmatpush3.bf16.msra.mxu1 %v741_v45 }
 0x311   : > { %1261 = vmatprep.subr.bf16.mxu1 %v1476_v31 }
 0x314   : > { %1262 = vmatpush3.bf16.msra.mxu1 %v740_v39 }
 0x315   : > { %1263 = vmatprep.subr.bf16.mxu1 %v1476_v31 }
 0x318   : > { %1264 = vmatpush3.bf16.msra.mxu1 %v739_v53 }
 0x319   : > { %1265 = vmatprep.subr.bf16.mxu1 %v1476_v31 }
 0x31c   : > { %1266 = vmatpush3.bf16.msra.mxu1 %v738_v15 }
 0x31d   : > { %1289 = vmatprep.subr.bf16.mxu1 %v1476_v31 }
 0x31f   : > { %1268 = vmatmul.mubr.bf16.vlgmr.msra.gmra.mxu1 %v1749_v35 }
 0x320   : > { %1305 = vmatprep.mubr.msk.bf16.mxu1 %vm1477_vm2, %v1476_v31 }
 0x3df   : > { %v780_v18 = vpop.f32.mrf.mxu1 }
 0x3e0   : > { %v781_v16 = vadd.f32 %v780_v18, %v1755_v33 }
 0x3e1   : > { %v1269_v34 = vpop.f32.mrf.mxu1 }
 0x3e2   : > { %v786_v56 = vsub.f32 0.0, %v781_v16 }
 0x3e3   : > { %v783_v32 = vpop.f32.mrf.mxu1 }
 0x3e4   : > { %v787_v57 = vmul.f32 1.442695, %v786_v56 }
 0x3e5   : > { %v1270_v58 = vpop.f32.mrf.mxu1 }
 0x3e6   : > { %1374 = vpow2.f32 %v787_v57 }
 0x3f3   : > { %v1375_v59 = vpop.eup %1374 }
 0x3f4   : > { %v789_v60 = vadd.f32 1.0, %v1375_v59 }
 0x3f6   : > { %1376 = vrcp.f32 %v789_v60 }
 0x403   : > { %v1377_v61 = vpop.eup %1376 }
 0x404   : > { %792 = vst [vmem:[#allocation2 + $0x4] sm:$0xf] %v1377_v61 }
 0x40b   : > { %v793_v63 = vld [vmem:[#allocation2] sm:$0xff] }
 0x40c   : > { %v794_v1 = vpack.c.bf16 %v793_v63, %v793_v63 }
 0x40e   : > { %1311 = vmatprep.subr.msk.bf16.mxu0 %vm448_vm1, %v794_v1  ;;  %v796_v2 = vsel %vm448_vm1, %v794_v1, 0 }
 0x40f   : > { %1272 = vmatpush3.bf16.msra.mxu0 %v796_v2 }
 0x412   : > { %1274 = vmatmul.mubr.msk.bf16.vlgmr.msra.gmra.mxu0 %vm423_vm0, %v1598_v13 }
 0x413   : > { %1277 = vmatprep.mubr.msk.bf16.mxu0 %vm423_vm0, %v1603_v14 }
 0x41a   : > { %1278 = vmatmul.mubr.msk.bf16.gmra.mxu0 %vm423_vm0, %v1624_v19 }
 0x41b   : > { %1281 = vmatprep.mubr.msk.bf16.mxu0 %vm423_vm0, %v1629_v20 }
 0x422   : > { %1282 = vmatmul.mubr.msk.bf16.gmra.mxu0 %vm423_vm0, %v1650_v25 }
 0x423   : > { %1285 = vmatprep.mubr.msk.bf16.mxu0 %vm423_vm0, %v1655_v26 }
 0x42a   : > { %1286 = vmatmul.mubr.msk.bf16.gmra.mxu0 %vm423_vm0, %v1673_v30 }
 0x4d2   : > { %v1275_v4 = vpop.f32.mrf.mxu0 }
 0x4d4   : > { %v832_v13 = vpop.f32.mrf.mxu0 }
 0x4d6   : > { %v1276_v5 = vpop.f32.mrf.mxu0 }
 0x4d8   : > { %v835_v6 = vpop.f32.mrf.mxu0 }
 0x4da   : > { %v1279_v14 = vpop.f32.mrf.mxu0 }
 0x4dc   : > { %v848_v7 = vpop.f32.mrf.mxu0 }
 0x4de   : > { %v1280_v8 = vpop.f32.mrf.mxu0 }
 0x4e0   : > { %v851_v19 = vpop.f32.mrf.mxu0 }
 0x4e2   : > { %v1283_v10 = vpop.f32.mrf.mxu0 }
 0x4e3   : > { %v873_v39 = vadd.f32 %v1283_v10, %v1698_v48  ;;  %v857_v48 = vadd.f32 %v1279_v14, %v1711_v3  ;;  %v841_v3 = vadd.f32 %v1275_v4, %v1728_v28 }
 0x4e4   : > { %v864_v11 = vpop.f32.mrf.mxu0 }
 0x4e5   : > { %v905_v53 = vmax.f32 %v873_v39, 0.0  ;;  %v901_v16 = vmax.f32 %v857_v48, 0.0  ;;  %v897_v59 = vmax.f32 %v841_v3, 0.0 }
 0x4e6   : > { %v1284_v20 = vpop.f32.mrf.mxu0 }
 0x4e7   : > { %v876_v50 = vadd.f32 %v1284_v20, %v1696_v46 }
 0x4e8   : > { %v867_v29 = vpop.f32.mrf.mxu0 }
 0x4ea   : > { %v1287_v37 = vpop.f32.mrf.mxu0 }
 0x4eb   : > { %v889_v40 = vadd.f32 %v1287_v37, %v1690_v38  ;;  %v906_v38 = vmax.f32 %v876_v50, 0.0 }
 0x4ec   : > { %v880_v25 = vpop.f32.mrf.mxu0 }
 0x4ed   : > { %v909_v24 = vmax.f32 %v889_v40, 0.0  ;;  %v881_v45 = vadd.f32 %v880_v25, %v1688_v36  ;;  %v865_v36 = vadd.f32 %v864_v11, %v1703_v54  ;;  %v916_v46 = vpack.c.bf16 %v906_v38, %v905_v53 }
 0x4ee   : > { %v1288_v26 = vpop.f32.mrf.mxu0  ;;  %v849_v54 = vadd.f32 %v848_v7, %v1719_v12  ;;  %v833_v12 = vadd.f32 %v832_v13, %v1737_v42 }
 0x4ef   : > { %v892_v44 = vadd.f32 %v1288_v26, %v1694_v43  ;;  %v907_v0 = vmax.f32 %v881_v45, 0.0  ;;  %v868_v43 = vadd.f32 %v867_v29, %v1700_v51  ;;  %v903_v55 = vmax.f32 %v865_v36, 0.0 }
 0x4f0   : > { %v883_v30 = vpop.f32.mrf.mxu0  ;;  %v852_v51 = vadd.f32 %v851_v19, %v1716_v9  ;;  %v899_v32 = vmax.f32 %v849_v54, 0.0  ;;  %v836_v9 = vadd.f32 %v835_v6, %v1733_v47  ;;  %v895_v61 = vmax.f32 %v833_v12, 0.0 }
 0x4f1   : > { %v910_v49 = vmax.f32 %v892_v44, 0.0  ;;  %v884_v21 = vadd.f32 %v883_v30, %v1692_v41  ;;  %v860_v41 = vadd.f32 %v1280_v8, %v1708_v62  ;;  %v904_v17 = vmax.f32 %v868_v43, 0.0 }
 0x4f2   : > { %v844_v62 = vadd.f32 %v1276_v5, %v1724_v22  ;;  %v900_v56 = vmax.f32 %v852_v51, 0.0  ;;  %v896_v60 = vmax.f32 %v836_v9, 0.0 }
 0x4f3   : > { %v918_v52 = vpack.c.bf16 %v910_v49, %v909_v24  ;;  %v908_v27 = vmax.f32 %v884_v21, 0.0  ;;  %v902_v15 = vmax.f32 %v860_v41, 0.0  ;;  %v915_v18 = vpack.c.bf16 %v904_v17, %v903_v55 }
 0x4f4   : > { %v898_v57 = vmax.f32 %v844_v62, 0.0  ;;  %v913_v58 = vpack.c.bf16 %v900_v56, %v899_v32  ;;  %v911_v28 = vpack.c.bf16 %v896_v60, %v895_v61 }
 0x4f5   : > { %1290 = vmatpush3.bf16.msra.mxu1 %v918_v52  ;;  %v917_v23 = vpack.c.bf16 %v908_v27, %v907_v0  ;;  %v914_v34 = vpack.c.bf16 %v902_v15, %v901_v16 }
 0x4f6   : > { %1291 = vmatprep.subr.bf16.mxu1 %v1476_v31  ;;  %v912_v22 = vpack.c.bf16 %v898_v57, %v897_v59 }
 0x4f9   : > { %1292 = vmatpush3.bf16.msra.mxu1 %v917_v23 }
 0x4fa   : > { %1293 = vmatprep.subr.bf16.mxu1 %v1476_v31 }
 0x4fd   : > { %1294 = vmatpush3.bf16.msra.mxu1 %v916_v46 }
 0x4fe   : > { %1295 = vmatprep.subr.bf16.mxu1 %v1476_v31 }
 0x501   : > { %1296 = vmatpush3.bf16.msra.mxu1 %v915_v18 }
 0x502   : > { %1297 = vmatprep.subr.bf16.mxu1 %v1476_v31 }
 0x505   : > { %1298 = vmatpush3.bf16.msra.mxu1 %v914_v34 }
 0x506   : > { %1299 = vmatprep.subr.bf16.mxu1 %v1476_v31 }
 0x509   : > { %1300 = vmatpush3.bf16.msra.mxu1 %v913_v58 }
 0x50a   : > { %1301 = vmatprep.subr.bf16.mxu1 %v1476_v31 }
 0x50d   : > { %1302 = vmatpush3.bf16.msra.mxu1 %v912_v22 }
 0x50e   : > { %1303 = vmatprep.subr.bf16.mxu1 %v1476_v31 }
 0x511   : > { %1304 = vmatpush3.bf16.msra.mxu1 %v911_v28 }
 0x514   : > { %1306 = vmatmul.mubr.bf16.vlgmr.msra.gmra.mxu1 %v1749_v35 }
 0x5d4   : > { %v953_v47 = vpop.f32.mrf.mxu1 }
 0x5d5   : > { %v954_v42 = vadd.f32 %v953_v47, %v1755_v33 }
 0x5d6   : > { %v1307_v63 = vpop.f32.mrf.mxu1 }
 0x5d7   : > { %v959_v1 = vsub.f32 0.0, %v954_v42  ;;  %vm966_vm3 = vcmp.gt.f32.partialorder %v954_v42, 0.0  ;;  %vm967_vm4 = vcmp.lt.f32.partialorder %v954_v42, 0.0 }
 0x5d8   : > { %v968_v2 = vsel %vm967_vm4, -1.0, %v1476_v31  ;;  %v956_v4 = vpop.f32.mrf.mxu1 }
 0x5d9   : > { %v960_v13 = vmul.f32 1.442695, %v959_v1  ;;  %v969_v35 = vsel %vm966_vm3, 1.0, %v968_v2 }
 0x5da   : > { %v1308_v5 = vpop.f32.mrf.mxu1  ;;  %v970_v6 = vsub.f32 1.0, %v969_v35 }
 0x5db   : > { %1378 = vpow2.f32 %v960_v13 }
 0x5dc   : > { %v971_v33 = vmul.f32 0.5, %v970_v6 }
 0x5de   : > { %972 = vst [vmem:[%s246_s9] sm:$0xf] %v971_v33 }
 0x5df   : > { %1395 = shalt.err (!%p1392_p3)
}
 0x5e0   : > { %s1396_s19 = scalar_lea.hbm %s990_s13, 64  ;;  %s1400_s11 = scalar_lea.hbm %s1919_s5, 128 }
 0x5e1   : > { %p1397_p4 = scmp.ne.s32.totalorder %s990_s13, %s1396_s19  ;;  %p1401_p9 = scmp.lt.s32.totalorder %s990_s13, %s1919_s5 }
 0x5e2   : > { %p1402_p10 = scmp.lt.s32.totalorder %s1400_s11, %s1396_s19 }
 0x5e3   : > { %p1398_p7 = pnand %p1397_p4, %p1553_p5 }
 0x5e4   : > { %p1403_p11 = por %p1402_p10, %p1401_p9 }
 0x5e5   : > { %p1399_p8 = pneg %p1398_p7 }
 0x5e7   : > { %p1404_p12 = pnand %p1403_p11, %p1399_p8 }
 0x5e9   : > { %1407 = shalt.err (!%p1404_p12)
}
 0x5ea   : > { %1312 = dma.vmem_to_hbm [thread:$0]  (%p1553_p5), %s993_s10, 64, %s990_s13, %s974_s14   ;;  %v1379_v31 = vpop.eup %1378 }
 0x5eb   : > { %v962_v14 = vadd.f32 1.0, %v1379_v31  ;;  %s253_s15 = scalar_lea.vmem [#allocation5], %s1100_s28  ;;  %s1924_s17 = sshll.u32 %s1536_s25, 6 }
 0x5ec   : > { %s1005_s16 = sshll.u32 %s253_s15, 4  ;;  %s1878_s19 = scalar_lea.hbm %s1920_s6, %s1924_s17  ;;  %s1006_s16 = int_to_ptr.vmem [resolvable:$true] %s1005_s16 }
 0x5ed   : > { %1380 = vrcp.f32 %v962_v14  ;;  %s979_s20 = scalar_lea.sflag [#allocation6], %s1845_s26  ;;  %s1408_s9 = scalar_lea.vmem %s1006_s16, 64 }
 0x5ee   : > { %p1409_p13 = scmp.ne.s32.totalorder %s1006_s16, %s1408_s9  ;;  %s1479_s10 = smov [#allocation5]  }
 0x5ef   : > { %s1412_s13 = sshll.u32 %s1479_s10, 4  ;;  %s1413_s13 = int_to_ptr.vmem [resolvable:$false] %s1412_s13 }
 0x5f0   : > { %p1410_p0 = pnand %p1409_p13, %p1553_p5  ;;  %s1414_s28 = scalar_lea.vmem %s1413_s13, 128 }
 0x5f1   : > { %p1415_p2 = scmp.lt.s32.totalorder %s1006_s16, %s1413_s13  ;;  %p1416_p3 = scmp.lt.s32.totalorder %s1414_s28, %s1408_s9 }
 0x5f2   : > { %p1411_p1 = pneg %p1410_p0 }
 0x5f3   : > { %p1417_p4 = por %p1416_p3, %p1415_p2 }
 0x5f5   : > { %p1418_p7 = pnand %p1417_p4, %p1411_p1 }
 0x5fa   : > { %v1381_v7 = vpop.eup %1380 }
 0x5fb   : > { %965 = vst [vmem:[%s253_s15] sm:$0xf] %v1381_v7 }
 0x5fc   : > { %1421 = shalt.err (!%p1418_p7)
}
 0x5fd   : > { %s1422_s25 = scalar_lea.hbm %s1878_s19, 64  ;;  %s1426_s11 = scalar_lea.hbm %s1920_s6, 128 }
 0x5fe   : > { %p1423_p8 = scmp.ne.s32.totalorder %s1878_s19, %s1422_s25  ;;  %p1427_p11 = scmp.lt.s32.totalorder %s1878_s19, %s1920_s6 }
 0x5ff   : > { %p1428_p12 = scmp.lt.s32.totalorder %s1426_s11, %s1422_s25 }
 0x600   : > { %p1424_p9 = pnand %p1423_p8, %p1553_p5 }
 0x601   : > { %p1429_p13 = por %p1428_p12, %p1427_p11 }
 0x602   : > { %p1425_p10 = pneg %p1424_p9 }
 0x604   : > { %p1430_p0 = pnand %p1429_p13, %p1425_p10 }
 0x606   : > { %1433 = shalt.err (!%p1430_p0)
}
 0x607   : > { %1313 = dma.vmem_to_hbm [thread:$0]  (%p1553_p5), %s1006_s16, 64, %s1878_s19, %s979_s20  }
 0x608 PF: > { %p1323_p1 = scmp.ge.s32.totalorder %s1472_s24, 2  ;;  %s1017_s17 = sand.u32 1, %s1460_s21  }
 0x609   : > { %s1018_s29 = scalar_lea.sflag [#allocation4], %s1017_s17 }
 0x60a   : > { %p1317_p2 = pnand %p1323_p1, %p1557_p6 }
 0x60c   : > { %p1318_p3 = pneg %p1317_p2 }
 0x60e   : > { %1451 = dma.done.wait (%p1318_p3), %s1018_s29, 64  }
 0x60f   : > { %1453 = vsyncadd (%p1318_p3), %s1018_s29, 4294967232  ;;  %s1027_s18 = scalar_lea.sflag [#allocation6], %s1017_s17 }
 0x610   : > { %1455 = dma.done.wait (%p1318_p3), %s1027_s18, 64  }
 0x611   : > { %1457 = vsyncadd (%p1318_p3), %s1027_s18, 4294967232  ;;  %p20_p5 = scmp.ge.s32.totalorder %s1540_s27, 4   ;;  %s1925_s21 = smov %s1464_s22 }
 0x612   : > { %s1926_s22 = smov %s1468_s23  ;;  %s1927_s23 = smov %s1551_s30 }
 0x613   : > { %s1928_s24 = smov %s1540_s27  ;;  %22 = sbr.rel (!%p20_p5) target bundleno = 5 (0x5), region = 92 }
 0x618   :  { %1032 = vsyncpa [#allocation4], 1 }
 0x619   :  { %1034 = vsyncpa [#allocation4 + $0x1], 1 }
 0x61a   :  { %1035 = vsyncpa [#allocation6], 1 }
 0x61b   :  { %1037 = vsyncpa [#allocation6 + $0x1], 1 }

</bundles_post_ra>
